<compile_context>
chip_gen: v7x
topology: tpu7x:2x2x1
jax: 0.10.0
libtpu: 0.0.40
codegen_flags: <defaults>
</compile_context>

<pallas_src>
import functools
import math

import jax
import jax.numpy as jnp
from jax.experimental import pallas as pl
from jax.experimental.pallas import tpu as pltpu

LN_EPS = 1e-5            # nn.LayerNorm default
MASK_FILL = -1000000000.0  # masked_fill_ value in Mask_Attention


def _gelu_tanh(x):
    # TODO(synk): nn.GELU() defaults to the exact erf formulation; erf lowering
    # is not guaranteed in Mosaic, so the tanh approximation is used here (and
    # in the in-script reference).
    c = 0.7978845608028654  # sqrt(2/pi)
    return 0.5 * x * (1.0 + jnp.tanh(c * (x + 0.044715 * x * x * x)))


def _layernorm(x, w, b):
    mu = jnp.mean(x, axis=-1, keepdims=True)
    xc = x - mu
    var = jnp.mean(xc * xc, axis=-1, keepdims=True)
    return xc * jax.lax.rsqrt(var + LN_EPS) * w + b


def _layer_kernel(x_ref, mask_ref, ln1w_ref, ln1b_ref, wqkv_ref, wout_ref,
                  bout_ref, ln2w_ref, ln2b_ref, wff1_ref, bff1_ref, wff2_ref,
                  bff2_ref, out_ref, *, heads, dim_head, scale):
    # One batch element per grid step; all heads handled inside the step.
    x = x_ref[0].astype(jnp.float32)              # (N, D)
    masked = mask_ref[0].astype(jnp.int32) != 0   # (N, N) bool, int8 in HBM

    # --- p_1 = LayerNorm(dim); replaces x (residuals add to the LN output) ---
    y = _layernorm(x, ln1w_ref[...], ln1b_ref[...])               # (N, D)

    # --- Mask_Attention ---------------------------------------------------
    inner = heads * dim_head
    qkv = jnp.dot(y, wqkv_ref[...], preferred_element_type=jnp.float32)
    q_all = qkv[:, 0 * inner:1 * inner]
    k_all = qkv[:, 1 * inner:2 * inner]
    v_all = qkv[:, 2 * inner:3 * inner]

    ctx_heads = []
    for h in range(heads):                         # small static unroll
        sl = slice(h * dim_head, (h + 1) * dim_head)
        qh = q_all[:, sl]
        kh = k_all[:, sl]
        vh = v_all[:, sl]
        # scores = q @ k^T via a transposed-RHS contraction (no k.T copy).
        s = jax.lax.dot_general(qh, kh, (((1,), (1,)), ((), ())),
                                preferred_element_type=jnp.float32) * scale
        s = jnp.where(masked, jnp.float32(MASK_FILL), s)
        m = jnp.max(s, axis=-1, keepdims=True)
        e = jnp.exp(s - m)
        denom = jnp.sum(e, axis=-1, keepdims=True)
        attn = e * pl.reciprocal(denom, approx=False)
        ctx_heads.append(jnp.dot(attn, vh, preferred_element_type=jnp.float32))
    ctx = jnp.concatenate(ctx_heads, axis=-1)      # (N, inner), never hits HBM

    attn_out = (jnp.dot(ctx, wout_ref[...], preferred_element_type=jnp.float32)
                + bout_ref[...])
    x1 = attn_out + y                              # residual on normalized x

    # --- p_2 = LayerNorm(dim) ----------------------------------------------
    y2 = _layernorm(x1, ln2w_ref[...], ln2b_ref[...])

    # --- FeedForward (Dropout(p=0) / eval mode -> identity) -----------------
    h1 = (jnp.dot(y2, wff1_ref[...], preferred_element_type=jnp.float32)
          + bff1_ref[...])
    g = _gelu_tanh(h1)
    ff = (jnp.dot(g, wff2_ref[...], preferred_element_type=jnp.float32)
          + bff2_ref[...])

    out_ref[0] = (ff + y2).astype(out_ref.dtype)   # lane-dense (N, D) store


def _layer_forward(x, mask_i8, p, *, heads, dim_head):
    B, N, D = x.shape

    kernel = functools.partial(_layer_kernel, heads=heads, dim_head=dim_head,
                               scale=dim_head ** -0.5)

    weight_names = ["ln1_w", "ln1_b", "w_qkv", "w_out", "b_out",
                    "ln2_w", "ln2_b", "w_ff1", "b_ff1", "w_ff2", "b_ff2"]
    weights = [p[k] for k in weight_names]

    in_specs = [
        pl.BlockSpec((1, N, D), lambda b: (b, 0, 0)),   # x
        pl.BlockSpec((1, N, N), lambda b: (b, 0, 0)),   # mask (int8)
    ] + [pl.BlockSpec(w.shape, lambda b: (0, 0)) for w in weights]

    return pl.pallas_call(
        kernel,
        out_shape=jax.ShapeDtypeStruct((B, N, D), x.dtype),
        grid_spec=pltpu.PrefetchScalarGridSpec(
            num_scalar_prefetch=0,
            grid=(B,),
            in_specs=in_specs,
            out_specs=pl.BlockSpec((1, N, D), lambda b: (b, 0, 0)),
        ),
        compiler_params=pltpu.CompilerParams(
            dimension_semantics=("parallel",),
            vmem_limit_bytes=32 * 1024 * 1024,
        ),
    )(x, mask_i8, *weights)


def mask_transformer_forward(x, attn_mask, layers, *, heads, dim_head):
    """Pallas forward for Mask_Transformer (eval mode, dropout=0)."""
    mask_i8 = attn_mask.astype(jnp.int8)   # 4x smaller HBM mask stream vs int32
    for p in layers:
        x = _layer_forward(x, mask_i8, p, heads=heads, dim_head=dim_head)
    return x


# ----------------------------- parameters ----------------------------------


def init_params(key, *, dim, depth, heads, dim_head, mlp_dim):
    """Per-layer weights, stored (in, out) so both kernel and reference use x @ W."""
    inner = heads * dim_head
    project_out = not (heads == 1 and dim_head == dim)
    layers = []
    for _ in range(depth):
        key, *ks = jax.random.split(key, 12)
        if project_out:
            w_out = jax.random.normal(ks[1], (inner, dim), jnp.float32) / math.sqrt(inner)
            b_out = jax.random.normal(ks[2], (1, dim), jnp.float32) * 0.02
        else:  # nn.Identity() case
            w_out = jnp.eye(inner, dtype=jnp.float32)
            b_out = jnp.zeros((1, dim), jnp.float32)
        layers.append(dict(
            ln1_w=1.0 + 0.05 * jax.random.normal(ks[7], (1, dim), jnp.float32),
            ln1_b=0.05 * jax.random.normal(ks[8], (1, dim), jnp.float32),
            w_qkv=jax.random.normal(ks[0], (dim, 3 * inner), jnp.float32) / math.sqrt(dim),
            w_out=w_out,
            b_out=b_out,
            ln2_w=1.0 + 0.05 * jax.random.normal(ks[9], (1, dim), jnp.float32),
            ln2_b=0.05 * jax.random.normal(ks[10], (1, dim), jnp.float32),
            w_ff1=jax.random.normal(ks[3], (dim, mlp_dim), jnp.float32) / math.sqrt(dim),
            b_ff1=jax.random.normal(ks[4], (1, mlp_dim), jnp.float32) * 0.02,
            w_ff2=jax.random.normal(ks[5], (mlp_dim, dim), jnp.float32) / math.sqrt(mlp_dim),
            b_ff2=jax.random.normal(ks[6], (1, dim), jnp.float32) * 0.02,
        ))
    return layers


# ----------------------------- reference ------------------------------------


def _reference_forward(x, attn_mask, layers, *, heads, dim_head):
    HP = jax.lax.Precision.HIGHEST
    scale = dim_head ** -0.5
    for p in layers:
        y = _layernorm(x, p["ln1_w"], p["ln1_b"])
        qkv = jnp.einsum("bnd,df->bnf", y, p["w_qkv"], precision=HP)
        q, k, v = jnp.split(qkv, 3, axis=-1)
        B, N, inner = q.shape

        def heads_first(t):
            return t.reshape(B, N, heads, dim_head).transpose(0, 2, 1, 3)

        qh, kh, vh = map(heads_first, (q, k, v))
        dots = jnp.einsum("bhid,bhjd->bhij", qh, kh, precision=HP) * scale
        dots = jnp.where(attn_mask[:, None, :, :], MASK_FILL, dots)
        attn = jax.nn.softmax(dots, axis=-1)
        out = jnp.einsum("bhij,bhjd->bhid", attn, vh, precision=HP)
        out = out.transpose(0, 2, 1, 3).reshape(B, N, inner)
        out = jnp.einsum("bnf,fd->bnd", out, p["w_out"], precision=HP) + p["b_out"]
        x = out + y
        y2 = _layernorm(x, p["ln2_w"], p["ln2_b"])
        h1 = _gelu_tanh(jnp.einsum("bnd,df->bnf", y2, p["w_ff1"], precision=HP)
                        + p["b_ff1"])
        x = jnp.einsum("bnf,fd->bnd", h1, p["w_ff2"], precision=HP) + p["b_ff2"] + y2
    return x


if __name__ == "__main__":
    # Small shapes consistent with the module's forward signature.
    B, N = 2, 8
    dim, depth, heads, dim_head, mlp_dim = 128, 2, 4, 32, 64

    key = jax.random.PRNGKey(0)
    kx, km, kp = jax.random.split(key, 3)
    x = jax.random.normal(kx, (B, N, dim), dtype=jnp.float32)
    # True == masked (matches torch masked_fill_ semantics).
    attn_mask = jax.random.bernoulli(km, p=0.2, shape=(B, N, N))
    layers = init_params(kp, dim=dim, depth=depth, heads=heads,
                         dim_head=dim_head, mlp_dim=mlp_dim)

    out = mask_transformer_forward(x, attn_mask, layers,
                                   heads=heads, dim_head=dim_head)
    out = jax.block_until_ready(out)

    ref = _reference_forward(x, attn_mask, layers,
                             heads=heads, dim_head=dim_head)
    assert out.shape == (B, N, dim)
    assert jnp.allclose(out, ref, atol=2e-3, rtol=2e-3), float(
        jnp.max(jnp.abs(out - ref)))

    print("KERNEL_OK")
</pallas_src>

<mosaic_0001>
module attributes {stable_mosaic.version = 11 : i64} {
  func.func @_layer_kernel(%arg0: i32, %arg1: memref<1x8x128xf32, #tpu.memory_space<vmem>>, %arg2: memref<1x8x8xi8, #tpu.memory_space<vmem>>, %arg3: memref<1x128xf32, #tpu.memory_space<vmem>>, %arg4: memref<1x128xf32, #tpu.memory_space<vmem>>, %arg5: memref<128x384xf32, #tpu.memory_space<vmem>>, %arg6: memref<128x128xf32, #tpu.memory_space<vmem>>, %arg7: memref<1x128xf32, #tpu.memory_space<vmem>>, %arg8: memref<1x128xf32, #tpu.memory_space<vmem>>, %arg9: memref<1x128xf32, #tpu.memory_space<vmem>>, %arg10: memref<128x64xf32, #tpu.memory_space<vmem>>, %arg11: memref<1x64xf32, #tpu.memory_space<vmem>>, %arg12: memref<64x128xf32, #tpu.memory_space<vmem>>, %arg13: memref<1x128xf32, #tpu.memory_space<vmem>>, %arg14: memref<1x8x128xf32, #tpu.memory_space<vmem>>) attributes {dimension_semantics = [#tpu.dimension_semantics<parallel>], iteration_bounds = array<i64: 2>, scalar_prefetch = 0 : i64, scratch_operands = 0 : i64, tpu.core_type = #tpu.core_type<tc>, window_params = [{transform_indices = @transform_0, window_bounds = array<i64: 1, 8, 128>}, {transform_indices = @transform_1, window_bounds = array<i64: 1, 8, 8>}, {pipeline_mode = #tpu.pipeline_mode<synchronous>, transform_indices = @transform_2, window_bounds = array<i64: 1, 128>}, {pipeline_mode = #tpu.pipeline_mode<synchronous>, transform_indices = @transform_3, window_bounds = array<i64: 1, 128>}, {pipeline_mode = #tpu.pipeline_mode<synchronous>, transform_indices = @transform_4, window_bounds = array<i64: 128, 384>}, {pipeline_mode = #tpu.pipeline_mode<synchronous>, transform_indices = @transform_5, window_bounds = array<i64: 128, 128>}, {pipeline_mode = #tpu.pipeline_mode<synchronous>, transform_indices = @transform_6, window_bounds = array<i64: 1, 128>}, {pipeline_mode = #tpu.pipeline_mode<synchronous>, transform_indices = @transform_7, window_bounds = array<i64: 1, 128>}, {pipeline_mode = #tpu.pipeline_mode<synchronous>, transform_indices = @transform_8, window_bounds = array<i64: 1, 128>}, {pipeline_mode = #tpu.pipeline_mode<synchronous>, transform_indices = @transform_9, window_bounds = array<i64: 128, 64>}, {pipeline_mode = #tpu.pipeline_mode<synchronous>, transform_indices = @transform_10, window_bounds = array<i64: 1, 64>}, {pipeline_mode = #tpu.pipeline_mode<synchronous>, transform_indices = @transform_11, window_bounds = array<i64: 64, 128>}, {pipeline_mode = #tpu.pipeline_mode<synchronous>, transform_indices = @transform_12, window_bounds = array<i64: 1, 128>}, {transform_indices = @transform_13, window_bounds = array<i64: 1, 8, 128>}]} {
    %c0 = arith.constant 0 : index
    %c0_0 = arith.constant 0 : index
    %c0_1 = arith.constant 0 : index
    %0 = vector.load %arg1[%c0, %c0_0, %c0_1] : memref<1x8x128xf32, #tpu.memory_space<vmem>>, vector<1x8x128xf32>
    %1 = vector.shape_cast %0 : vector<1x8x128xf32> to vector<8x128xf32>
    %c0_2 = arith.constant 0 : index
    %c0_3 = arith.constant 0 : index
    %c0_4 = arith.constant 0 : index
    %2 = vector.load %arg2[%c0_2, %c0_3, %c0_4] : memref<1x8x8xi8, #tpu.memory_space<vmem>>, vector<1x8x8xi8>
    %3 = vector.shape_cast %2 : vector<1x8x8xi8> to vector<8x8xi8>
    %4 = arith.extsi %3 : vector<8x8xi8> to vector<8x8xi32>
    %c0_i32 = arith.constant 0 : i32
    %5 = vector.broadcast %c0_i32 : i32 to vector<8x8xi32>
    %6 = arith.cmpi ne, %4, %5 : vector<8x8xi32>
    %c0_5 = arith.constant 0 : index
    %c0_6 = arith.constant 0 : index
    %7 = vector.load %arg3[%c0_5, %c0_6] : memref<1x128xf32, #tpu.memory_space<vmem>>, vector<1x128xf32>
    %c0_7 = arith.constant 0 : index
    %c0_8 = arith.constant 0 : index
    %8 = vector.load %arg4[%c0_7, %c0_8] : memref<1x128xf32, #tpu.memory_space<vmem>>, vector<1x128xf32>
    %cst = arith.constant dense<0.000000e+00> : vector<8xf32>
    %9 = vector.multi_reduction <add>, %1, %cst [1] : vector<8x128xf32> to vector<8xf32>
    %10 = vector.shape_cast %9 : vector<8xf32> to vector<8x1xf32>
    %cst_9 = arith.constant 1.280000e+02 : f32
    %11 = vector.broadcast %cst_9 : f32 to vector<8x1xf32>
    %12 = arith.divf %10, %11 : vector<8x1xf32>
    %13 = vector.broadcast %12 : vector<8x1xf32> to vector<8x128xf32>
    %14 = arith.subf %1, %13 : vector<8x128xf32>
    %15 = arith.mulf %14, %14 : vector<8x128xf32>
    %cst_10 = arith.constant dense<0.000000e+00> : vector<8xf32>
    %16 = vector.multi_reduction <add>, %15, %cst_10 [1] : vector<8x128xf32> to vector<8xf32>
    %17 = vector.shape_cast %16 : vector<8xf32> to vector<8x1xf32>
    %cst_11 = arith.constant 1.280000e+02 : f32
    %18 = vector.broadcast %cst_11 : f32 to vector<8x1xf32>
    %19 = arith.divf %17, %18 : vector<8x1xf32>
    %cst_12 = arith.constant 9.99999974E-6 : f32
    %20 = vector.broadcast %cst_12 : f32 to vector<8x1xf32>
    %21 = arith.addf %19, %20 : vector<8x1xf32>
    %22 = math.rsqrt %21 : vector<8x1xf32>
    %23 = vector.broadcast %22 : vector<8x1xf32> to vector<8x128xf32>
    %24 = arith.mulf %14, %23 : vector<8x128xf32>
    %25 = vector.broadcast %7 : vector<1x128xf32> to vector<8x128xf32>
    %26 = arith.mulf %24, %25 : vector<8x128xf32>
    %27 = vector.broadcast %8 : vector<1x128xf32> to vector<8x128xf32>
    %28 = arith.addf %26, %27 : vector<8x128xf32>
    %c0_13 = arith.constant 0 : index
    %c0_14 = arith.constant 0 : index
    %29 = vector.load %arg5[%c0_13, %c0_14] : memref<128x384xf32, #tpu.memory_space<vmem>>, vector<128x384xf32>
    %cst_15 = arith.constant dense<0.000000e+00> : vector<8x384xf32>
    %30 = tpu.matmul %28, %29, %cst_15 {dimension_numbers = #tpu.dot_dimension_numbers<[1], [0], [0], [1], [0, 0, 1, 1], [], []>} : vector<8x128xf32>, vector<128x384xf32>, vector<8x384xf32> -> vector<8x384xf32>
    %31 = vector.extract_strided_slice %30 {offsets = [0, 0], sizes = [8, 128], strides = [1, 1]} : vector<8x384xf32> to vector<8x128xf32>
    %32 = vector.extract_strided_slice %30 {offsets = [0, 128], sizes = [8, 128], strides = [1, 1]} : vector<8x384xf32> to vector<8x128xf32>
    %33 = vector.extract_strided_slice %30 {offsets = [0, 256], sizes = [8, 128], strides = [1, 1]} : vector<8x384xf32> to vector<8x128xf32>
    %34 = vector.extract_strided_slice %31 {offsets = [0, 0], sizes = [8, 32], strides = [1, 1]} : vector<8x128xf32> to vector<8x32xf32>
    %35 = vector.extract_strided_slice %32 {offsets = [0, 0], sizes = [8, 32], strides = [1, 1]} : vector<8x128xf32> to vector<8x32xf32>
    %36 = vector.extract_strided_slice %33 {offsets = [0, 0], sizes = [8, 32], strides = [1, 1]} : vector<8x128xf32> to vector<8x32xf32>
    %cst_16 = arith.constant dense<0.000000e+00> : vector<8x8xf32>
    %37 = tpu.matmul %34, %35, %cst_16 {dimension_numbers = #tpu.dot_dimension_numbers<[1], [1], [0], [0], [0, 0, 1, 0], [], []>} : vector<8x32xf32>, vector<8x32xf32>, vector<8x8xf32> -> vector<8x8xf32>
    %cst_17 = arith.constant 0.176776692 : f32
    %38 = vector.broadcast %cst_17 : f32 to vector<8x8xf32>
    %39 = arith.mulf %37, %38 : vector<8x8xf32>
    %cst_18 = arith.constant -1.000000e+09 : f32
    %40 = vector.broadcast %cst_18 : f32 to vector<8x8xf32>
    %41 = arith.select %6, %40, %39 : vector<8x8xi1>, vector<8x8xf32>
    %cst_19 = arith.constant dense<0xFF800000> : vector<8xf32>
    %42 = vector.multi_reduction <maximumf>, %41, %cst_19 [1] : vector<8x8xf32> to vector<8xf32>
    %43 = vector.shape_cast %42 : vector<8xf32> to vector<8x1xf32>
    %44 = vector.broadcast %43 : vector<8x1xf32> to vector<8x8xf32>
    %45 = arith.subf %41, %44 : vector<8x8xf32>
    %46 = math.exp %45 : vector<8x8xf32>
    %cst_20 = arith.constant dense<0.000000e+00> : vector<8xf32>
    %47 = vector.multi_reduction <add>, %46, %cst_20 [1] : vector<8x8xf32> to vector<8xf32>
    %48 = vector.shape_cast %47 : vector<8xf32> to vector<8x1xf32>
    %49 = tpu.reciprocal %48 : vector<8x1xf32> -> vector<8x1xf32>
    %50 = vector.broadcast %49 : vector<8x1xf32> to vector<8x8xf32>
    %51 = arith.mulf %46, %50 : vector<8x8xf32>
    %cst_21 = arith.constant dense<0.000000e+00> : vector<8x32xf32>
    %52 = tpu.matmul %51, %36, %cst_21 {dimension_numbers = #tpu.dot_dimension_numbers<[1], [0], [0], [1], [0, 0, 1, 1], [], []>} : vector<8x8xf32>, vector<8x32xf32>, vector<8x32xf32> -> vector<8x32xf32>
    %53 = vector.extract_strided_slice %31 {offsets = [0, 32], sizes = [8, 32], strides = [1, 1]} : vector<8x128xf32> to vector<8x32xf32>
    %54 = vector.extract_strided_slice %32 {offsets = [0, 32], sizes = [8, 32], strides = [1, 1]} : vector<8x128xf32> to vector<8x32xf32>
    %55 = vector.extract_strided_slice %33 {offsets = [0, 32], sizes = [8, 32], strides = [1, 1]} : vector<8x128xf32> to vector<8x32xf32>
    %cst_22 = arith.constant dense<0.000000e+00> : vector<8x8xf32>
    %56 = tpu.matmul %53, %54, %cst_22 {dimension_numbers = #tpu.dot_dimension_numbers<[1], [1], [0], [0], [0, 0, 1, 0], [], []>} : vector<8x32xf32>, vector<8x32xf32>, vector<8x8xf32> -> vector<8x8xf32>
    %cst_23 = arith.constant 0.176776692 : f32
    %57 = vector.broadcast %cst_23 : f32 to vector<8x8xf32>
    %58 = arith.mulf %56, %57 : vector<8x8xf32>
    %cst_24 = arith.constant -1.000000e+09 : f32
    %59 = vector.broadcast %cst_24 : f32 to vector<8x8xf32>
    %60 = arith.select %6, %59, %58 : vector<8x8xi1>, vector<8x8xf32>
    %cst_25 = arith.constant dense<0xFF800000> : vector<8xf32>
    %61 = vector.multi_reduction <maximumf>, %60, %cst_25 [1] : vector<8x8xf32> to vector<8xf32>
    %62 = vector.shape_cast %61 : vector<8xf32> to vector<8x1xf32>
    %63 = vector.broadcast %62 : vector<8x1xf32> to vector<8x8xf32>
    %64 = arith.subf %60, %63 : vector<8x8xf32>
    %65 = math.exp %64 : vector<8x8xf32>
    %cst_26 = arith.constant dense<0.000000e+00> : vector<8xf32>
    %66 = vector.multi_reduction <add>, %65, %cst_26 [1] : vector<8x8xf32> to vector<8xf32>
    %67 = vector.shape_cast %66 : vector<8xf32> to vector<8x1xf32>
    %68 = tpu.reciprocal %67 : vector<8x1xf32> -> vector<8x1xf32>
    %69 = vector.broadcast %68 : vector<8x1xf32> to vector<8x8xf32>
    %70 = arith.mulf %65, %69 : vector<8x8xf32>
    %cst_27 = arith.constant dense<0.000000e+00> : vector<8x32xf32>
    %71 = tpu.matmul %70, %55, %cst_27 {dimension_numbers = #tpu.dot_dimension_numbers<[1], [0], [0], [1], [0, 0, 1, 1], [], []>} : vector<8x8xf32>, vector<8x32xf32>, vector<8x32xf32> -> vector<8x32xf32>
    %72 = vector.extract_strided_slice %31 {offsets = [0, 64], sizes = [8, 32], strides = [1, 1]} : vector<8x128xf32> to vector<8x32xf32>
    %73 = vector.extract_strided_slice %32 {offsets = [0, 64], sizes = [8, 32], strides = [1, 1]} : vector<8x128xf32> to vector<8x32xf32>
    %74 = vector.extract_strided_slice %33 {offsets = [0, 64], sizes = [8, 32], strides = [1, 1]} : vector<8x128xf32> to vector<8x32xf32>
    %cst_28 = arith.constant dense<0.000000e+00> : vector<8x8xf32>
    %75 = tpu.matmul %72, %73, %cst_28 {dimension_numbers = #tpu.dot_dimension_numbers<[1], [1], [0], [0], [0, 0, 1, 0], [], []>} : vector<8x32xf32>, vector<8x32xf32>, vector<8x8xf32> -> vector<8x8xf32>
    %cst_29 = arith.constant 0.176776692 : f32
    %76 = vector.broadcast %cst_29 : f32 to vector<8x8xf32>
    %77 = arith.mulf %75, %76 : vector<8x8xf32>
    %cst_30 = arith.constant -1.000000e+09 : f32
    %78 = vector.broadcast %cst_30 : f32 to vector<8x8xf32>
    %79 = arith.select %6, %78, %77 : vector<8x8xi1>, vector<8x8xf32>
    %cst_31 = arith.constant dense<0xFF800000> : vector<8xf32>
    %80 = vector.multi_reduction <maximumf>, %79, %cst_31 [1] : vector<8x8xf32> to vector<8xf32>
    %81 = vector.shape_cast %80 : vector<8xf32> to vector<8x1xf32>
    %82 = vector.broadcast %81 : vector<8x1xf32> to vector<8x8xf32>
    %83 = arith.subf %79, %82 : vector<8x8xf32>
    %84 = math.exp %83 : vector<8x8xf32>
    %cst_32 = arith.constant dense<0.000000e+00> : vector<8xf32>
    %85 = vector.multi_reduction <add>, %84, %cst_32 [1] : vector<8x8xf32> to vector<8xf32>
    %86 = vector.shape_cast %85 : vector<8xf32> to vector<8x1xf32>
    %87 = tpu.reciprocal %86 : vector<8x1xf32> -> vector<8x1xf32>
    %88 = vector.broadcast %87 : vector<8x1xf32> to vector<8x8xf32>
    %89 = arith.mulf %84, %88 : vector<8x8xf32>
    %cst_33 = arith.constant dense<0.000000e+00> : vector<8x32xf32>
    %90 = tpu.matmul %89, %74, %cst_33 {dimension_numbers = #tpu.dot_dimension_numbers<[1], [0], [0], [1], [0, 0, 1, 1], [], []>} : vector<8x8xf32>, vector<8x32xf32>, vector<8x32xf32> -> vector<8x32xf32>
    %91 = vector.extract_strided_slice %31 {offsets = [0, 96], sizes = [8, 32], strides = [1, 1]} : vector<8x128xf32> to vector<8x32xf32>
    %92 = vector.extract_strided_slice %32 {offsets = [0, 96], sizes = [8, 32], strides = [1, 1]} : vector<8x128xf32> to vector<8x32xf32>
    %93 = vector.extract_strided_slice %33 {offsets = [0, 96], sizes = [8, 32], strides = [1, 1]} : vector<8x128xf32> to vector<8x32xf32>
    %cst_34 = arith.constant dense<0.000000e+00> : vector<8x8xf32>
    %94 = tpu.matmul %91, %92, %cst_34 {dimension_numbers = #tpu.dot_dimension_numbers<[1], [1], [0], [0], [0, 0, 1, 0], [], []>} : vector<8x32xf32>, vector<8x32xf32>, vector<8x8xf32> -> vector<8x8xf32>
    %cst_35 = arith.constant 0.176776692 : f32
    %95 = vector.broadcast %cst_35 : f32 to vector<8x8xf32>
    %96 = arith.mulf %94, %95 : vector<8x8xf32>
    %cst_36 = arith.constant -1.000000e+09 : f32
    %97 = vector.broadcast %cst_36 : f32 to vector<8x8xf32>
    %98 = arith.select %6, %97, %96 : vector<8x8xi1>, vector<8x8xf32>
    %cst_37 = arith.constant dense<0xFF800000> : vector<8xf32>
    %99 = vector.multi_reduction <maximumf>, %98, %cst_37 [1] : vector<8x8xf32> to vector<8xf32>
    %100 = vector.shape_cast %99 : vector<8xf32> to vector<8x1xf32>
    %101 = vector.broadcast %100 : vector<8x1xf32> to vector<8x8xf32>
    %102 = arith.subf %98, %101 : vector<8x8xf32>
    %103 = math.exp %102 : vector<8x8xf32>
    %cst_38 = arith.constant dense<0.000000e+00> : vector<8xf32>
    %104 = vector.multi_reduction <add>, %103, %cst_38 [1] : vector<8x8xf32> to vector<8xf32>
    %105 = vector.shape_cast %104 : vector<8xf32> to vector<8x1xf32>
    %106 = tpu.reciprocal %105 : vector<8x1xf32> -> vector<8x1xf32>
    %107 = vector.broadcast %106 : vector<8x1xf32> to vector<8x8xf32>
    %108 = arith.mulf %103, %107 : vector<8x8xf32>
    %cst_39 = arith.constant dense<0.000000e+00> : vector<8x32xf32>
    %109 = tpu.matmul %108, %93, %cst_39 {dimension_numbers = #tpu.dot_dimension_numbers<[1], [0], [0], [1], [0, 0, 1, 1], [], []>} : vector<8x8xf32>, vector<8x32xf32>, vector<8x32xf32> -> vector<8x32xf32>
    %110 = tpu.concatenate %52, %71, %90, %109 in 1 : vector<8x32xf32>, vector<8x32xf32>, vector<8x32xf32>, vector<8x32xf32> -> vector<8x128xf32>
    %c0_40 = arith.constant 0 : index
    %c0_41 = arith.constant 0 : index
    %111 = vector.load %arg6[%c0_40, %c0_41] : memref<128x128xf32, #tpu.memory_space<vmem>>, vector<128x128xf32>
    %cst_42 = arith.constant dense<0.000000e+00> : vector<8x128xf32>
    %112 = tpu.matmul %110, %111, %cst_42 {dimension_numbers = #tpu.dot_dimension_numbers<[1], [0], [0], [1], [0, 0, 1, 1], [], []>} : vector<8x128xf32>, vector<128x128xf32>, vector<8x128xf32> -> vector<8x128xf32>
    %c0_43 = arith.constant 0 : index
    %c0_44 = arith.constant 0 : index
    %113 = vector.load %arg7[%c0_43, %c0_44] : memref<1x128xf32, #tpu.memory_space<vmem>>, vector<1x128xf32>
    %114 = vector.broadcast %113 : vector<1x128xf32> to vector<8x128xf32>
    %115 = arith.addf %112, %114 : vector<8x128xf32>
    %116 = arith.addf %115, %28 : vector<8x128xf32>
    %c0_45 = arith.constant 0 : index
    %c0_46 = arith.constant 0 : index
    %117 = vector.load %arg8[%c0_45, %c0_46] : memref<1x128xf32, #tpu.memory_space<vmem>>, vector<1x128xf32>
    %c0_47 = arith.constant 0 : index
    %c0_48 = arith.constant 0 : index
    %118 = vector.load %arg9[%c0_47, %c0_48] : memref<1x128xf32, #tpu.memory_space<vmem>>, vector<1x128xf32>
    %cst_49 = arith.constant dense<0.000000e+00> : vector<8xf32>
    %119 = vector.multi_reduction <add>, %116, %cst_49 [1] : vector<8x128xf32> to vector<8xf32>
    %120 = vector.shape_cast %119 : vector<8xf32> to vector<8x1xf32>
    %cst_50 = arith.constant 1.280000e+02 : f32
    %121 = vector.broadcast %cst_50 : f32 to vector<8x1xf32>
    %122 = arith.divf %120, %121 : vector<8x1xf32>
    %123 = vector.broadcast %122 : vector<8x1xf32> to vector<8x128xf32>
    %124 = arith.subf %116, %123 : vector<8x128xf32>
    %125 = arith.mulf %124, %124 : vector<8x128xf32>
    %cst_51 = arith.constant dense<0.000000e+00> : vector<8xf32>
    %126 = vector.multi_reduction <add>, %125, %cst_51 [1] : vector<8x128xf32> to vector<8xf32>
    %127 = vector.shape_cast %126 : vector<8xf32> to vector<8x1xf32>
    %cst_52 = arith.constant 1.280000e+02 : f32
    %128 = vector.broadcast %cst_52 : f32 to vector<8x1xf32>
    %129 = arith.divf %127, %128 : vector<8x1xf32>
    %cst_53 = arith.constant 9.99999974E-6 : f32
    %130 = vector.broadcast %cst_53 : f32 to vector<8x1xf32>
    %131 = arith.addf %129, %130 : vector<8x1xf32>
    %132 = math.rsqrt %131 : vector<8x1xf32>
    %133 = vector.broadcast %132 : vector<8x1xf32> to vector<8x128xf32>
    %134 = arith.mulf %124, %133 : vector<8x128xf32>
    %135 = vector.broadcast %117 : vector<1x128xf32> to vector<8x128xf32>
    %136 = arith.mulf %134, %135 : vector<8x128xf32>
    %137 = vector.broadcast %118 : vector<1x128xf32> to vector<8x128xf32>
    %138 = arith.addf %136, %137 : vector<8x128xf32>
    %c0_54 = arith.constant 0 : index
    %c0_55 = arith.constant 0 : index
    %139 = vector.load %arg10[%c0_54, %c0_55] : memref<128x64xf32, #tpu.memory_space<vmem>>, vector<128x64xf32>
    %cst_56 = arith.constant dense<0.000000e+00> : vector<8x64xf32>
    %140 = tpu.matmul %138, %139, %cst_56 {dimension_numbers = #tpu.dot_dimension_numbers<[1], [0], [0], [1], [0, 0, 1, 1], [], []>} : vector<8x128xf32>, vector<128x64xf32>, vector<8x64xf32> -> vector<8x64xf32>
    %c0_57 = arith.constant 0 : index
    %c0_58 = arith.constant 0 : index
    %141 = vector.load %arg11[%c0_57, %c0_58] : memref<1x64xf32, #tpu.memory_space<vmem>>, vector<1x64xf32>
    %142 = vector.broadcast %141 : vector<1x64xf32> to vector<8x64xf32>
    %143 = arith.addf %140, %142 : vector<8x64xf32>
    %cst_59 = arith.constant 5.000000e-01 : f32
    %144 = vector.broadcast %cst_59 : f32 to vector<8x64xf32>
    %145 = arith.mulf %144, %143 : vector<8x64xf32>
    %cst_60 = arith.constant 4.471500e-02 : f32
    %146 = vector.broadcast %cst_60 : f32 to vector<8x64xf32>
    %147 = arith.mulf %146, %143 : vector<8x64xf32>
    %148 = arith.mulf %147, %143 : vector<8x64xf32>
    %149 = arith.mulf %148, %143 : vector<8x64xf32>
    %150 = arith.addf %143, %149 : vector<8x64xf32>
    %cst_61 = arith.constant 0.797884583 : f32
    %151 = vector.broadcast %cst_61 : f32 to vector<8x64xf32>
    %152 = arith.mulf %151, %150 : vector<8x64xf32>
    %153 = math.tanh %152 : vector<8x64xf32>
    %cst_62 = arith.constant 1.000000e+00 : f32
    %154 = vector.broadcast %cst_62 : f32 to vector<8x64xf32>
    %155 = arith.addf %154, %153 : vector<8x64xf32>
    %156 = arith.mulf %145, %155 : vector<8x64xf32>
    %c0_63 = arith.constant 0 : index
    %c0_64 = arith.constant 0 : index
    %157 = vector.load %arg12[%c0_63, %c0_64] : memref<64x128xf32, #tpu.memory_space<vmem>>, vector<64x128xf32>
    %cst_65 = arith.constant dense<0.000000e+00> : vector<8x128xf32>
    %158 = tpu.matmul %156, %157, %cst_65 {dimension_numbers = #tpu.dot_dimension_numbers<[1], [0], [0], [1], [0, 0, 1, 1], [], []>} : vector<8x64xf32>, vector<64x128xf32>, vector<8x128xf32> -> vector<8x128xf32>
    %c0_66 = arith.constant 0 : index
    %c0_67 = arith.constant 0 : index
    %159 = vector.load %arg13[%c0_66, %c0_67] : memref<1x128xf32, #tpu.memory_space<vmem>>, vector<1x128xf32>
    %160 = vector.broadcast %159 : vector<1x128xf32> to vector<8x128xf32>
    %161 = arith.addf %158, %160 : vector<8x128xf32>
    %162 = arith.addf %161, %138 : vector<8x128xf32>
    %c0_68 = arith.constant 0 : index
    %c0_69 = arith.constant 0 : index
    %c0_70 = arith.constant 0 : index
    %163 = vector.load %arg14[%c0_68, %c0_69, %c0_70] : memref<1x8x128xf32, #tpu.memory_space<vmem>>, vector<1x8x128xf32>
    %164 = vector.shape_cast %163 : vector<1x8x128xf32> to vector<8x128xf32>
    %165 = vector.shape_cast %162 : vector<8x128xf32> to vector<1x8x128xf32>
    tpu.vector_store %arg14[%c0_68, %c0_69, %c0_70], %165 {strides = array<i32>} : memref<1x8x128xf32, #tpu.memory_space<vmem>>, vector<1x8x128xf32>,
    return
  }
  func.func @transform_0(%arg0: i32) -> (i32, i32, i32) {
    %c0_i32 = arith.constant 0 : i32
    %c0_i32_0 = arith.constant 0 : i32
    %c0_i32_1 = arith.constant 0 : i32
    return %arg0, %c0_i32, %c0_i32_0 : i32, i32, i32
  }
  func.func @transform_1(%arg0: i32) -> (i32, i32, i32) {
    %c0_i32 = arith.constant 0 : i32
    %c0_i32_0 = arith.constant 0 : i32
    %c0_i32_1 = arith.constant 0 : i32
    return %arg0, %c0_i32, %c0_i32_0 : i32, i32, i32
  }
  func.func @transform_2(%arg0: i32) -> (i32, i32) {
    %c0_i32 = arith.constant 0 : i32
    %c0_i32_0 = arith.constant 0 : i32
    %c0_i32_1 = arith.constant 0 : i32
    return %c0_i32, %c0_i32_0 : i32, i32
  }
  func.func @transform_3(%arg0: i32) -> (i32, i32) {
    %c0_i32 = arith.constant 0 : i32
    %c0_i32_0 = arith.constant 0 : i32
    %c0_i32_1 = arith.constant 0 : i32
    return %c0_i32, %c0_i32_0 : i32, i32
  }
  func.func @transform_4(%arg0: i32) -> (i32, i32) {
    %c0_i32 = arith.constant 0 : i32
    %c0_i32_0 = arith.constant 0 : i32
    %c0_i32_1 = arith.constant 0 : i32
    return %c0_i32, %c0_i32_0 : i32, i32
  }
  func.func @transform_5(%arg0: i32) -> (i32, i32) {
    %c0_i32 = arith.constant 0 : i32
    %c0_i32_0 = arith.constant 0 : i32
    %c0_i32_1 = arith.constant 0 : i32
    return %c0_i32, %c0_i32_0 : i32, i32
  }
  func.func @transform_6(%arg0: i32) -> (i32, i32) {
    %c0_i32 = arith.constant 0 : i32
    %c0_i32_0 = arith.constant 0 : i32
    %c0_i32_1 = arith.constant 0 : i32
    return %c0_i32, %c0_i32_0 : i32, i32
  }
  func.func @transform_7(%arg0: i32) -> (i32, i32) {
    %c0_i32 = arith.constant 0 : i32
    %c0_i32_0 = arith.constant 0 : i32
    %c0_i32_1 = arith.constant 0 : i32
    return %c0_i32, %c0_i32_0 : i32, i32
  }
  func.func @transform_8(%arg0: i32) -> (i32, i32) {
    %c0_i32 = arith.constant 0 : i32
    %c0_i32_0 = arith.constant 0 : i32
    %c0_i32_1 = arith.constant 0 : i32
    return %c0_i32, %c0_i32_0 : i32, i32
  }
  func.func @transform_9(%arg0: i32) -> (i32, i32) {
    %c0_i32 = arith.constant 0 : i32
    %c0_i32_0 = arith.constant 0 : i32
    %c0_i32_1 = arith.constant 0 : i32
    return %c0_i32, %c0_i32_0 : i32, i32
  }
  func.func @transform_10(%arg0: i32) -> (i32, i32) {
    %c0_i32 = arith.constant 0 : i32
    %c0_i32_0 = arith.constant 0 : i32
    %c0_i32_1 = arith.constant 0 : i32
    return %c0_i32, %c0_i32_0 : i32, i32
  }
  func.func @transform_11(%arg0: i32) -> (i32, i32) {
    %c0_i32 = arith.constant 0 : i32
    %c0_i32_0 = arith.constant 0 : i32
    %c0_i32_1 = arith.constant 0 : i32
    return %c0_i32, %c0_i32_0 : i32, i32
  }
  func.func @transform_12(%arg0: i32) -> (i32, i32) {
    %c0_i32 = arith.constant 0 : i32
    %c0_i32_0 = arith.constant 0 : i32
    %c0_i32_1 = arith.constant 0 : i32
    return %c0_i32, %c0_i32_0 : i32, i32
  }
  func.func @transform_13(%arg0: i32) -> (i32, i32, i32) {
    %c0_i32 = arith.constant 0 : i32
    %c0_i32_0 = arith.constant 0 : i32
    %c0_i32_1 = arith.constant 0 : i32
    return %arg0, %c0_i32, %c0_i32_0 : i32, i32, i32
  }
}

</mosaic_0001>

<bundles_post_ra>
// kernel: tpu_custom_call.1
= control target key start
LH: loop header
LB: loop body
LE: loop exit
PB: predicated region body
PF: predicated region fallthrough
CT: control target
= control target key end

     0   :  { %s2973_s0 = inlined_call_operand.vmem [shape: f32[2,8,128], index: 0, kind: input, shape index: {}]   ;;  %s2974_s1 = inlined_call_operand.hbm [shape: s8[2,8,8], index: 1, kind: input, shape index: {}]   ;;  %s2975_s2 = inlined_call_operand.vmem [shape: f32[1,128], index: 2, kind: input, shape index: {}]   ;;  %s2976_s3 = inlined_call_operand.vmem [shape: f32[1,128], index: 3, kind: input, shape index: {}]   ;;  %s2977_s4 = inlined_call_operand.hbm [shape: f32[128,384], index: 4, kind: input, shape index: {}]   ;;  %s2978_s5 = inlined_call_operand.vmem [shape: f32[128,128], index: 5, kind: input, shape index: {}]   ;;  %s2979_s6 = inlined_call_operand.vmem [shape: f32[1,128], index: 6, kind: input, shape index: {}]   ;;  %s2980_s7 = inlined_call_operand.vmem [shape: f32[1,128], index: 7, kind: input, shape index: {}]   ;;  %s2981_s8 = inlined_call_operand.vmem [shape: f32[1,128], index: 8, kind: input, shape index: {}]   ;;  %s2982_s9 = inlined_call_operand.vmem [shape: f32[128,64], index: 9, kind: input, shape index: {}]   ;;  %s2983_s10 = inlined_call_operand.vmem [shape: f32[1,64], index: 10, kind: input, shape index: {}]   ;;  %s2984_s11 = inlined_call_operand.vmem [shape: f32[64,128], index: 11, kind: input, shape index: {}]   ;;  %s2985_s12 = inlined_call_operand.vmem [shape: f32[1,128], index: 12, kind: input, shape index: {}]   ;;  %s2986_s13 = inlined_call_operand.hbm [shape: f32[2,8,128], index: 13, kind: output, shape index: {}]  }
   0x1   :  { %2995 = sst [smem:[#allocation14_spill]] %s2983_s10 }
   0x2   :  { %2996 = sst [smem:[#allocation15_spill]] %s2985_s12 }
   0x3   :  { %2997 = sst [smem:[#allocation16_spill]] %s2986_s13 }
   0x4   :  { %18 = vsyncpa [#allocation3], 0 }
   0x5   :  { %20 = vsyncpa [#allocation3 + $0x1], 0 }
   0x6   :  { %21 = vsyncpa [#allocation6], 0 }
   0x7   :  { %22 = vsyncpa [#allocation4], 0 }
   0x8   :  { %24 = vsyncpa [#allocation4 + $0x1], 0  ;;  %s2500_s25 = smov 0   ;;  %s2502_s26 = smov 0  }
   0x9   :  { %s2504_s27 = smov 0   ;;  %s2506_s28 = smov 0  }
   0xa LB: > { %2998 = sst [smem:[#allocation11_spill]] %s2405_s25  ;;  %s2521_s29 = sadd.s32 4294967295, %s2417_s28   ;;  %s2417_s28 = sphi %s2506_s28, %s3021_s28   ;;  %s2413_s27 = sphi %s2504_s27, %s3024_s27   ;;  %s2409_s26 = sphi %s2502_s26, %s3023_s26   ;;  %s2405_s25 = sphi %s2500_s25, %s3022_s25  }
   0xb   : > { %s1811_s30 = sadd.s32 4294967294, %s2417_s28   ;;  %p76_p0 = scmp.ne.s32.totalorder %s2409_s26, %s2405_s25 }
   0xc   : > { %p2992_p1 = scmp.eq.s32.totalorder %s2521_s29, 0  ;;  %p337_p3 = scmp.eq.s32.totalorder %s1811_s30, 1 }
   0xd   : > { %p1812_p5 = scmp.ge.s32.totalorder %s2417_s28, 1  ;;  %p344_p7 = scmp.lt.s32.totalorder %s2417_s28, 3 }
   0xe   : > { %p2530_p4 = por %p2992_p1, %p76_p0  ;;  %p2535_p6 = por %p337_p3, %p76_p0 }
   0xf   : > { %p2540_p8 = pnand %p1812_p5, %p344_p7  ;;  %s2419_s17 = smov [#allocation5]  }
  0x10   : > { %s2999_s14 = scalar_select %p2530_p4, 1, 0 }
  0x11   : > { %s3000_s15 = scalar_select %p2535_p6, 1, 0 }
  0x12   : > { %s3002_s16 = scalar_select %p2540_p8, 1, 0 }
  0x13   : > { %3001 = sst [smem:[#allocation12_spill]] %s3000_s15  ;;  %s362_s18 = sshll.u32 %s2419_s17, 4  ;;  %s2544_s18 = int_to_ptr.vmem [resolvable:$true] %s362_s18 }
  0x14   : > { %p2210_p9 = pneg %p2540_p8  ;;  %s2556_s20 = sadd.s32 1, %s2417_s28  }
  0x15   : > { %3004 = sst [smem:[#allocation13_spill]] %s2556_s20  ;;  %s63_s21 = sadd.s32 1, %s2413_s27 }
  0x16   : > { %p2551_p11 = pnand %p2210_p9, %p2992_p1  ;;  %s60_s22 = ssub.s32 %s2417_s28, %s2556_s20 }
  0x17   : > { %s2289_s30 = scalar_lea.hbm %s2977_s4, 6144 }
  0x18   : > { %p2290_p12 = scmp.ne.s32.totalorder %s2977_s4, %s2289_s30  ;;  %p2291_p13 = pneg %p2551_p11 }
  0x19   : > { %p2296_p5 = scmp.lt.u32.totalorder %s2289_s30, %s2977_s4 }
  0x1a   : > { %p2292_p0 = pnand %p2291_p13, %p2290_p12 }
  0x1c   : > { %p2293_p3 = pneg %p2292_p0 }
  0x1e   : > { %p2298_p7 = pnand %p2296_p5, %p2293_p3 }
  0x20   : > { %2301 = shalt.err (!%p2298_p7)
}
  0x21   : > { %s2302_s20 = scalar_lea.vmem %s2544_s18, 6144  ;;  %p2310_p2 = scmp.lt.s32.totalorder %s2544_s18, %s2544_s18 }
  0x22   : > { %p2303_p9 = scmp.ne.s32.totalorder %s2544_s18, %s2302_s20  ;;  %p2311_p6 = scmp.lt.s32.totalorder %s2302_s20, %s2302_s20 }
  0x24   : > { %p2305_p10 = pnand %p2303_p9, %p2291_p13  ;;  %p2312_p4 = por %p2311_p6, %p2310_p2 }
  0x26   : > { %p2306_p1 = pneg %p2305_p10 }
  0x28   : > { %p2313_p8 = pnand %p2312_p4, %p2306_p1 }
  0x2a   : > { %2316 = shalt.err (!%p2313_p8)
}
  0x2b   : > { %s2420_s15 = smov 384   ;;  %s2421_s13 = smov 24  }
  0x2c   : > { %2213 = dma.hbm_to_vmem [thread:$0]  (!%p2551_p11), %s2977_s4, 6144, %s2544_s18, [#allocation6], %s2420_s15, %s2420_s15, %s2421_s13  }
  0x2d   : > { %p61_p2 = scmp.eq.s32.totalorder %s60_s22, 0  ;;  %p70_p1 = scmp.ne.s32.totalorder %s2413_s27, %s2409_s26 }
  0x2e   : > { %p71_p4 = scmp.eq.s32.totalorder %s2417_s28, 0  ;;  %p2223_p6 = scmp.lt.s32.totalorder %s2417_s28, 2 }
  0x2f   : > { %s2587_s20 = scalar_select %p61_p2, %s2413_s27, %s63_s21  }
  0x30   : > { %p72_p8 = por %p71_p4, %p70_p1  ;;  %p3005_p10 = scmp.eq.s32.totalorder %s2521_s29, 1 }
  0x31   : > { %s407_s30 = sand.u32 1, %s2413_s27   ;;  %s1816_s17 = sshll.u32 %s2417_s28, 5 }
  0x32   : > { %p2591_p12 = por %p3005_p10, %p70_p1  ;;  %s1815_s12 = sshll.u32 %s407_s30, 1 }
  0x33   : > { %s2600_s25 = scalar_lea.hbm %s2974_s1, %s1816_s17  ;;  %s411_s18 = scalar_lea.vmem [#allocation2], %s1815_s12 }
  0x34   : > { %s418_s21 = sshll.u32 %s411_s18, 4  ;;  %p2602_p11 = pnand %p2223_p6, %p72_p8  ;;  %s2606_s21 = int_to_ptr.vmem [resolvable:$true] %s418_s21 }
  0x35   : > { %s408_s15 = scalar_lea.sflag [#allocation3], %s407_s30  ;;  %s2317_s13 = scalar_lea.hbm %s2600_s25, 32 }
  0x36   : > { %p2318_p13 = scmp.ne.s32.totalorder %s2600_s25, %s2317_s13  ;;  %p2319_p0 = pneg %p2602_p11 }
  0x37   : > { %s2322_s23 = scalar_lea.hbm %s2974_s1, 64  ;;  %p2323_p7 = scmp.lt.u32.totalorder %s2600_s25, %s2974_s1 }
  0x38   : > { %p2320_p3 = pnand %p2319_p0, %p2318_p13  ;;  %p2324_p9 = scmp.lt.u32.totalorder %s2322_s23, %s2317_s13 }
  0x39   : > { %p2326_p1 = scmp.lt.u32.totalorder %s2317_s13, %s2600_s25 }
  0x3a   : > { %p2321_p5 = pneg %p2320_p3  ;;  %p2325_p2 = por %p2324_p9, %p2323_p7 }
  0x3c   : > { %p2327_p4 = por %p2326_p1, %p2325_p2 }
  0x3e   : > { %p2328_p6 = pnand %p2327_p4, %p2321_p5 }
  0x40   : > { %2331 = shalt.err (!%p2328_p6)
}
  0x41   : > { %s2332_s30 = scalar_lea.vmem %s2606_s21, 32  ;;  %s2422_s18 = smov [#allocation2]  }
  0x42   : > { %p2333_p8 = scmp.ne.s32.totalorder %s2606_s21, %s2332_s30  ;;  %s2337_s10 = sshll.u32 %s2422_s18, 4  ;;  %s2338_s10 = int_to_ptr.vmem [resolvable:$false] %s2337_s10 }
  0x43   : > { %s2339_s12 = scalar_lea.vmem %s2338_s10, 64  ;;  %p2340_p3 = scmp.lt.s32.totalorder %s2606_s21, %s2338_s10 }
  0x44   : > { %p2335_p10 = pnand %p2333_p8, %p2319_p0  ;;  %p2341_p7 = scmp.lt.s32.totalorder %s2339_s12, %s2332_s30 }
  0x46   : > { %p2336_p13 = pneg %p2335_p10  ;;  %p2342_p9 = por %p2341_p7, %p2340_p3 }
  0x48   : > { %p2343_p2 = pnand %p2342_p9, %p2336_p13 }
  0x4a   : > { %2346 = shalt.err (!%p2343_p2)
}
  0x4b   : > { %2217 = dma.hbm_to_vmem [thread:$0]  (!%p2602_p11), %s2600_s25, 32, %s2606_s21, %s408_s15  }
  0x4c   : > { %p3008_p5 = scmp.ne.s32.totalorder %s3002_s16, 0 }
  0x4d   : > { %s2636_s13 = sand.u32 (!%p3008_p5), 1, %s2409_s26   ;;  %p3009_p0 = scmp.ne.s32.totalorder (!%p3008_p5), %s2999_s14, 0 }
  0x4e   : > { %427 = sbr.rel (%p3008_p5) target bundleno = 3017 (0xbc9), region = 72  ;;  %s1818_s23 = sshll.u32 (!%p3008_p5), %s2636_s13, 1 }
  0x4f   : > { %s430_s17 = scalar_lea.sflag (!%p3008_p5), [#allocation3], %s2636_s13  ;;  %s2640_s19 = scalar_lea.vmem (!%p3008_p5), [#allocation2], %s1818_s23 }
  0x55   : > { %2392 = dma.done.wait (%p3009_p0), %s430_s17, 32  }
  0x56   : > { %2394 = vsyncadd (%p3009_p0), %s430_s17, 4294967264  ;;  %p3010_p11 = scmp.eq.s32.totalorder %s2521_s29, 0 }
  0x58   : > { %2396 = dma.done.wait (%p3010_p11), [#allocation6], 6144   ;;  %p3011_p1 = pmov %p3010_p11 }
  0x59   : > { %p484_p4 = scmp.lt.s32.totalorder %s2521_s29, 1  ;;  %v521_v1 = vld [vmem:[#allocation5 + $0x8] sm:$0xff]  ;;  %v524_v2 = vld [vmem:[#allocation5 + $0x20] sm:$0xff]  ;;  %v2423_v5 = vmov 0.0|0.0   ;;  %v523_v6 = vld [vmem:[#allocation5 + $0x18] sm:$0xff]  ;;  %v2424_v57 = vmov 0.0  }
  0x5a   : > { %2398 = vsyncadd (%p3011_p1), [#allocation6], 4294961152  ;;  %v520_v3 = vld [vmem:[#allocation5] sm:$0xff]  ;;  %v2086_v4 = vpack.c.bf16 %v524_v2, %v521_v1  ;;  %2118 = vmatprep.subr.bf16.mxu1 %v2423_v5  ;;  %v522_v7 = vld [vmem:[#allocation5 + $0x10] sm:$0xff]  ;;  %632 = vmatprep.mubr.f32.mxu0 %v2424_v57  ;;  %vm2425_vm0 = vmmov 0   ;;  %vm709_vm1 = vcmask 261120  }
  0x5b   : > { %s485_s16 = scalar_select %p484_p4, %s2521_s29, 1  ;;  %v525_v8 = vld [vmem:[#allocation5 + $0x28] sm:$0xff]  ;;  %v2088_v9 = vpack.c.bf16 %v523_v6, %v520_v3  ;;  %v527_v11 = vld [vmem:[#allocation5 + $0x38] sm:$0xff]  ;;  %v530_v12 = vld [vmem:[#allocation5 + $0x50] sm:$0xff]  ;;  %1954 = vmatprep.mubr.msk.f32.mxu1 %vm2425_vm0, %v2424_v57  ;;  %vm788_vm3 = vcmask 64512   ;;  %vm1388_vm4 = vcmask 523264  }
  0x5c   : > { %v2119_v10 = vpack.c.bf16 %v525_v8, %v522_v7  ;;  %v526_v13 = vld [vmem:[#allocation5 + $0x30] sm:$0xff]  ;;  %2087 = vmatprep.subr.bf16.mxu0 %v2086_v4  ;;  %v2090_v14 = vpack.c.bf16 %v530_v12, %v527_v11  ;;  %v529_v15 = vld [vmem:[#allocation5 + $0x48] sm:$0xff]  ;;  %v528_v16 = vld [vmem:[#allocation5 + $0x40] sm:$0xff]  ;;  %s2426_s12 = smov 96   ;;  %s2427_s23 = smov 32   ;;  %vm1390_vm5 = vcmask 785408  }
  0x5d   : > { %s1821_s25 = sshll.u32 %s485_s16, 3  ;;  %v531_v17 = vld [vmem:[#allocation5 + $0x58] sm:$0xff]  ;;  %2089 = vmatpush1.bf16.msra.mxu0 %v2088_v9  ;;  %v2092_v18 = vpack.c.bf16 %v529_v15, %v526_v13  ;;  %v533_v20 = vld [vmem:[#allocation5 + $0x68] sm:$0xff]  ;;  %v536_v21 = vld [vmem:[#allocation5 + $0x80] sm:$0xff]  ;;  %s2428_s17 = smov 64  }
  0x5e   : > { %s487_s15 = scalar_lea.vmem %s2973_s0, %s1821_s25  ;;  %2120 = vmatpush3.bf16.msra.mxu1 %v2119_v10  ;;  %v2122_v19 = vpack.c.bf16 %v531_v17, %v528_v16  ;;  %v532_v22 = vld [vmem:[#allocation5 + $0x60] sm:$0xff]  ;;  %2091 = vmatprep.subr.bf16.mxu0 %v2090_v14  ;;  %v2094_v23 = vpack.c.bf16 %v536_v21, %v533_v20  ;;  %v535_v24 = vld [vmem:[#allocation5 + $0x78] sm:$0xff]  ;;  %v534_v25 = vld [vmem:[#allocation5 + $0x70] sm:$0xff]  ;;  %s3014_s21 = sld [smem:[#allocation14_spill]] }
  0x5f   : > { %v488_v0 = vld [vmem:[%s487_s15] sm:$0xff]  ;;  %2121 = vmatprep.subr.bf16.mxu1 %v2423_v5  ;;  %v537_v26 = vld [vmem:[#allocation5 + $0x88] sm:$0xff]  ;;  %v2096_v27 = vpack.c.bf16 %v535_v24, %v532_v22  ;;  %v542_v34 = vld [vmem:[#allocation5 + $0xb0] sm:$0xff]  ;;  %s1820_s22 = sshll.u32 %s2636_s13, 3  ;;  %s3015_s30 = sld [smem:[#allocation15_spill]] }
  0x60   : > { %494 = vadd.xlane.f32.xlu0 %v488_v0  ;;  %v2125_v28 = vpack.c.bf16 %v537_v26, %v534_v25  ;;  %v539_v33 = vld [vmem:[#allocation5 + $0x98] sm:$0xff]  ;;  %v538_v36 = vld [vmem:[#allocation5 + $0x90] sm:$0xff]  ;;  %v541_v37 = vld [vmem:[#allocation5 + $0xa8] sm:$0xff]  ;;  %s1843_s18 = sshll.u32 %s2521_s29, 7  ;;  %s483_s10 = scalar_lea.vmem [#allocation7], %s1820_s22 }
  0x61   : > { %2093 = vmatpush1.bf16.msra.mxu0 %v2092_v18  ;;  %v2098_v35 = vpack.c.bf16 %v542_v34, %v539_v33  ;;  %v540_v38 = vld [vmem:[#allocation5 + $0xa0] sm:$0xff]  ;;  %v2100_v39 = vpack.c.bf16 %v541_v37, %v538_v36  ;;  %v543_v40 = vld [vmem:[#allocation5 + $0xb8] sm:$0xff]  ;;  %v545_v42 = vld [vmem:[#allocation5 + $0xc8] sm:$0xff]  ;;  %s1706_s25 = scalar_lea.sflag [#allocation4], %s2636_s13  ;;  %s2429_s29 = smov [#allocation7]  }
  0x62   : > { %2123 = vmatpush3.bf16.msra.mxu1 %v2122_v19  ;;  %2095 = vmatprep.subr.bf16.mxu0 %v2094_v23  ;;  %v2128_v41 = vpack.c.bf16 %v543_v40, %v540_v38  ;;  %v548_v43 = vld [vmem:[#allocation5 + $0xe0] sm:$0xff]  ;;  %v547_v46 = vld [vmem:[#allocation5 + $0xd8] sm:$0xff]  ;;  %v546_v47 = vld [vmem:[#allocation5 + $0xd0] sm:$0xff]  ;;  %s2351_s22 = sshll.u32 %s2429_s29, 4  ;;  %s2352_s22 = int_to_ptr.vmem [resolvable:$false] %s2351_s22 }
  0x63   : > { %2124 = vmatprep.subr.bf16.mxu1 %v2423_v5  ;;  %v2102_v44 = vpack.c.bf16 %v548_v43, %v545_v42  ;;  %v544_v45 = vld [vmem:[#allocation5 + $0xc0] sm:$0xff]  ;;  %v549_v49 = vld [vmem:[#allocation5 + $0xe8] sm:$0xff]  ;;  %v551_v50 = vld [vmem:[#allocation5 + $0xf8] sm:$0xff]  ;;  %s2353_s15 = scalar_lea.vmem %s2352_s22, 256 }
  0x64   : > { %v2104_v48 = vpack.c.bf16 %v547_v46, %v544_v45  ;;  %v554_v51 = vld [vmem:[#allocation5 + $0x110] sm:$0xff]  ;;  %v2131_v52 = vpack.c.bf16 %v549_v49, %v546_v47  ;;  %v553_v55 = vld [vmem:[#allocation5 + $0x108] sm:$0xff]  ;;  %v552_v56 = vld [vmem:[#allocation5 + $0x100] sm:$0xff] }
  0x65   : > { %2097 = vmatpush1.bf16.msra.mxu0 %v2096_v27  ;;  %v2106_v53 = vpack.c.bf16 %v554_v51, %v551_v50  ;;  %v550_v54 = vld [vmem:[#allocation5 + $0xf0] sm:$0xff]  ;;  %v555_v59 = vld [vmem:[#allocation5 + $0x118] sm:$0xff]  ;;  %v557_v60 = vld [vmem:[#allocation5 + $0x128] sm:$0xff] }
  0x66   : > { %2126 = vmatpush3.bf16.msra.mxu1 %v2125_v28  ;;  %2099 = vmatprep.subr.bf16.mxu0 %v2098_v35  ;;  %v2108_v58 = vpack.c.bf16 %v553_v55, %v550_v54  ;;  %v560_v61 = vld [vmem:[#allocation5 + $0x140] sm:$0xff]  ;;  %v2134_v62 = vpack.c.bf16 %v555_v59, %v552_v56  ;;  %v559_v1 = vld [vmem:[#allocation5 + $0x138] sm:$0xff]  ;;  %v558_v2 = vld [vmem:[#allocation5 + $0x130] sm:$0xff] }
  0x67   : > { %2127 = vmatprep.subr.bf16.mxu1 %v2423_v5  ;;  %v2110_v63 = vpack.c.bf16 %v560_v61, %v557_v60  ;;  %v561_v3 = vld [vmem:[#allocation5 + $0x148] sm:$0xff]  ;;  %v563_v4 = vld [vmem:[#allocation5 + $0x158] sm:$0xff]  ;;  %v566_v6 = vld [vmem:[#allocation5 + $0x170] sm:$0xff] }
  0x68   : > { %v2137_v8 = vpack.c.bf16 %v561_v3, %v558_v2  ;;  %v2114_v9 = vpack.c.bf16 %v566_v6, %v563_v4  ;;  %v562_v10 = vld [vmem:[#allocation5 + $0x150] sm:$0xff]  ;;  %v565_v11 = vld [vmem:[#allocation5 + $0x168] sm:$0xff]  ;;  %v564_v12 = vld [vmem:[#allocation5 + $0x160] sm:$0xff] }
  0x69   : > { %2101 = vmatpush1.bf16.msra.mxu0 %v2100_v39  ;;  %v567_v13 = vld [vmem:[#allocation5 + $0x178] sm:$0xff]  ;;  %v2116_v14 = vpack.c.bf16 %v565_v11, %v562_v10 }
  0x6a   : > { %2129 = vmatpush3.bf16.msra.mxu1 %v2128_v41  ;;  %2103 = vmatprep.subr.bf16.mxu0 %v2102_v44  ;;  %v2140_v15 = vpack.c.bf16 %v567_v13, %v564_v12  ;;  %v1822_v20 = vld [vmem:[%s2975_s2] ss:$0 sm:$0xff] }
  0x6b   : > { %2130 = vmatprep.subr.bf16.mxu1 %v2423_v5  ;;  %v1823_v22 = vld [vmem:[%s2976_s3] ss:$0 sm:$0xff] }
  0x6d   : > { %2105 = vmatpush1.bf16.msra.mxu0 %v2104_v48 }
  0x6e   : > { %2132 = vmatpush3.bf16.msra.mxu1 %v2131_v52  ;;  %2107 = vmatprep.subr.bf16.mxu0 %v2106_v53 }
  0x6f   : > { %2133 = vmatprep.subr.bf16.mxu1 %v2423_v5 }
  0x71   : > { %2109 = vmatpush1.bf16.msra.mxu0 %v2108_v58 }
  0x72   : > { %2135 = vmatpush3.bf16.msra.mxu1 %v2134_v62  ;;  %2111 = vmatprep.subr.bf16.mxu0 %v2110_v63 }
  0x73   : > { %2136 = vmatprep.subr.bf16.mxu1 %v2423_v5 }
  0x76   : > { %2138 = vmatpush3.bf16.msra.mxu1 %v2137_v8 }
  0x77   : > { %2139 = vmatprep.subr.bf16.mxu1 %v2423_v5 }
  0x7a   : > { %2141 = vmatpush3.bf16.msra.mxu1 %v2140_v15 }
  0x7b   : > { %1957 = vmatprep.subr.mxu1 %v2424_v57 }
  0xed   : > { %v495_v29 = vpop.xlane.xlu0 %494 }
  0xee   : > { %v497_v30 = vmul.f32 0.0078125, %v495_v29  ;;  %v489_v29 = vld [vmem:[%s2640_s19] sm:$0x3]  ;;  %s1719_s19 = sshll.u32 %s483_s10, 4  ;;  %s2931_s19 = int_to_ptr.vmem [resolvable:$true] %s1719_s19 }
  0xef   : > { %p2354_p13 = scmp.lt.s32.totalorder %s2931_s19, %s2352_s22 }
  0xf0   : > { %v2659_v31 = vsub.f32 %v488_v0, %v497_v30  ;;  %v556_v0 = vld [vmem:[#allocation5 + $0x120] sm:$0xff]  ;;  %v490_v30 = vunpack.c.0.s8 %v489_v29 }
  0xf1   : > { %v2112_v7 = vpack.c.bf16 %v559_v1, %v556_v0 }
  0xf2   : > { %v499_v32 = vmul.f32 %v2659_v31, %v2659_v31  ;;  %vm2699_vm2 = vcmp.ne.s32.totalorder %v490_v30, 0 }
  0xf3   : > { %2113 = vmatpush1.bf16.msra.mxu0 %v2112_v7 }
  0xf4   : > { %500 = vadd.xlane.f32.xlu0 %v499_v32  ;;  %2115 = vmatprep.subr.bf16.mxu0 %v2114_v9 }
  0xf7   : > { %2117 = vmatpush1.bf16.msra.mxu0 %v2116_v14 }
  0xf8   : > { %1977 = vmatprep.subr.mxu0 %v2424_v57 }
 0x181   : > { %v501_v16 = vpop.xlane.xlu0 %500 }
 0x182   : > { %v502_v17 = vmul.f32 0.0078125, %v501_v16 }
 0x184   : > { %v503_v18 = vadd.f32 1e-05, %v502_v17 }
 0x186   : > { %2267 = vrsqrt.f32 %v503_v18 }
 0x190   : > { %v2268_v19 = vpop.eup %2267 }
 0x191   : > { %v505_v21 = vmul.f32 %v2268_v19, %v2659_v31 }
 0x193   : > { %v512_v23 = vmul.f32 %v1822_v20, %v505_v21 }
 0x195   : > { %v2679_v24 = vadd.f32 %v1823_v22, %v512_v23 }
 0x197   : > { %633 = vmatmul.mubr.f32.vlgmr.msra.gmra.mrb[0].mxu0 %v2679_v24  ;;  %1955 = vmatmul.mubr.f32.vlgmr.msra.gmra.mrb[0].mxu1 %v2679_v24 }
 0x198   : > { %1959 = vmatprep.mubr.msk.f32.mxu1 %vm2425_vm0, %v2424_v57  ;;  %1979 = vmatprep.mubr.msk.f32.mxu0 %vm2425_vm0, %v2424_v57 }
 0x26a   : > { %v634_v25 = vpop.f32.mrb[0].mxu0  ;;  %v2687_v26 = vpop.f32.mrb[0].mxu1 }
 0x26b   : > { %v636_v27 = vpop.f32.mrb[1].mxu0  ;;  %v1956_v28 = vpop.f32.mrb[1].mxu1 }
 0x26c   : > { %875 = vrot.lane.b32.xlu0 %v636_v27, %s2426_s12  ;;  %1958 = vmatpush3.xpose.msk.msra.mxu1 %vm709_vm1, %v636_v27 }
 0x26d   : > { %1962 = vmatprep.subr.mxu1 %v2424_v57 }
 0x26f   : > { %1960 = vmatmul.mubr.msk.f32.vlgmr.msra.gmra.mrb[2].mxu1 %vm709_vm1, %v634_v25 }
 0x270   : > { %1210 = vrot.lane.b32.xlu0 %v636_v27, %s2427_s23  ;;  %1963 = vmatpush3.msra.mxu1 %v2687_v26 }
 0x271   : > { %1964 = vmatprep.mubr.msk.f32.mxu1 %vm2425_vm0, %v2424_v57  ;;  %1967 = vmatprep.subr.mxu1 %v2424_v57 }
 0x2de   : > { %v876_v44 = vpop.permute.xlu0 %875 }
 0x2e2   : > { %v1211_v47 = vpop.permute.xlu0 %1210 }
 0x342   : > { %v782_v31 = vpop.f32.mrb[2].mxu1 }
 0x343   : > { %v786_v33 = vmul.f32 0.17677669, %v782_v31  ;;  %v1961_v34 = vpop.f32.mrb[3].mxu1 }
 0x344   : > { %v1392_v34 = vld [vmem:[%s2978_s5] sm:$0xff] }
 0x345   : > { %v787_v35 = vsel %vm2699_vm2, -1e+09, %v786_v33 }
 0x346   : > { %v789_v36 = vsel %vm788_vm3, %v787_v35, -inf }
 0x347   : > { %790 = vmax.xlane.f32.xlu1 %v789_v36  ;;  %v1394_v36 = vld [vmem:[%s2978_s5 + $0x10] sm:$0xff] }
 0x358   : > { %873 = vrot.lane.b32.xlu1 %v634_v25, %s2426_s12 }
 0x35c   : > { %1043 = vrot.lane.b32.xlu1 %v636_v27, %s2428_s17 }
 0x3d4   : > { %v791_v37 = vpop.xlane.xlu1 %790 }
 0x3d5   : > { %v792_v38 = vsub.f32 %v787_v35, %v791_v37  ;;  %v1393_v35 = vld [vmem:[%s2978_s5 + $0x8] sm:$0xff] }
 0x3d6   : > { %v2143_v37 = vpack.c.bf16 %v1393_v35, %v1392_v34  ;;  %v1525_v34 = vld [vmem:[%s2982_s9 + $0x60] sm:$0xff]  ;;  %v1526_v35 = vld [vmem:[%s2982_s9 + $0x68] sm:$0xff] }
 0x3d7   : > { %v793_v39 = vmul.f32 1.442695, %v792_v38  ;;  %v1395_v38 = vld [vmem:[%s2978_s5 + $0x18] sm:$0xff] }
 0x3d8   : > { %v874_v40 = vpop.permute.xlu1 %873 }
 0x3d9   : > { %2269 = vpow2.f32 %v793_v39  ;;  %v2146_v39 = vpack.c.bf16 %v1395_v38, %v1394_v36  ;;  %v2185_v36 = vpack.c.bf16 %v1526_v35, %v1525_v34  ;;  %v1528_v38 = vld [vmem:[%s2982_s9 + $0x78] sm:$0xff] }
 0x3dc   : > { %v1044_v41 = vpop.permute.xlu1 %1043 }
 0x3dd   : > { %1978 = vmatpush3.xpose.msk.msra.mxu0 %vm709_vm1, %v1044_v41  ;;  %v1397_v41 = vld [vmem:[%s2978_s5 + $0x28] sm:$0xff] }
 0x3de   : > { %1987 = vmatprep.subr.mxu0 %v2424_v57 }
 0x3e3   : > { %v2270_v42 = vpop.eup %2269 }
 0x3e4   : > { %v795_v43 = vsel %vm788_vm3, %v2270_v42, 0.0 }
 0x3e5   : > { %796 = vadd.xlane.f32.xlu1 %v795_v43  ;;  %v1398_v43 = vld [vmem:[%s2978_s5 + $0x30] sm:$0xff] }
 0x3f6   : > { %1041 = vrot.lane.b32.xlu1 %v634_v25, %s2428_s17 }
 0x3fa   : > { %1208 = vrot.lane.b32.xlu1 %v634_v25, %s2427_s23 }
 0x472   : > { %v797_v45 = vpop.xlane.xlu1 %796 }
 0x473   : > { %2271 = vrcp.f32 %v797_v45 }
 0x476   : > { %v1042_v46 = vpop.permute.xlu1 %1041 }
 0x477   : > { %1980 = vmatmul.mubr.msk.f32.vlgmr.msra.gmra.mrb[2].mxu0 %vm709_vm1, %v1042_v46  ;;  %v1400_v46 = vld [vmem:[%s2978_s5 + $0x40] sm:$0xff] }
 0x478   : > { %1988 = vmatpush3.xpose.msk.msra.mxu0 %vm709_vm1, %v1211_v47  ;;  %1989 = vmatprep.mubr.msk.f32.mxu0 %vm2425_vm0, %v2424_v57  ;;  %v1401_v47 = vld [vmem:[%s2978_s5 + $0x48] sm:$0xff] }
 0x479   : > { %2142 = vmatprep.subr.bf16.mxu0 %v2423_v5 }
 0x47a   : > { %v1209_v48 = vpop.permute.xlu1 %1208 }
 0x47b   : > { %1990 = vmatmul.mubr.msk.f32.vlgmr.msra.gmra.mrb[4].mxu0 %vm709_vm1, %v1209_v48  ;;  %v2155_v48 = vpack.c.bf16 %v1401_v47, %v1400_v46  ;;  %v1838_v46 = vld [vmem:[%s2981_s8] ss:$0 sm:$0xff] }
 0x47c   : > { %2029 = vmatprep.mubr.msk.f32.mxu0 %vm2425_vm0, %v2424_v57  ;;  %2144 = vmatpush3.bf16.msra.mxu0 %v2143_v37  ;;  %v1527_v37 = vld [vmem:[%s2982_s9 + $0x70] sm:$0xff] }
 0x47d   : > { %v2272_v49 = vpop.eup %2271  ;;  %2145 = vmatprep.subr.bf16.mxu0 %v2423_v5 }
 0x47e   : > { %v799_v50 = vmul.f32 %v2272_v49, %v2270_v42  ;;  %v1402_v49 = vld [vmem:[%s2978_s5 + $0x50] sm:$0xff] }
 0x480   : > { %1965 = vmatmul.mubr.msk.f32.vlgmr.msra.gmra.mrb[4].mxu1 %vm788_vm3, %v799_v50  ;;  %2147 = vmatpush3.bf16.msra.mxu0 %v2146_v39  ;;  %v1403_v50 = vld [vmem:[%s2978_s5 + $0x58] sm:$0xff]  ;;  %v2188_v39 = vpack.c.bf16 %v1528_v38, %v1527_v37 }
 0x481   : > { %1968 = vmatpush3.xpose.msk.msra.mxu1 %vm709_vm1, %v876_v44  ;;  %1969 = vmatprep.mubr.msk.f32.mxu1 %vm2425_vm0, %v2424_v57  ;;  %v1399_v44 = vld [vmem:[%s2978_s5 + $0x38] sm:$0xff] }
 0x482   : > { %1972 = vmatprep.subr.mxu1 %v2424_v57  ;;  %2148 = vmatprep.subr.bf16.mxu0 %v2423_v5  ;;  %v2152_v45 = vpack.c.bf16 %v1399_v44, %v1398_v43  ;;  %v1837_v44 = vld [vmem:[%s2980_s7] ss:$0 sm:$0xff] }
 0x484   : > { %1970 = vmatmul.mubr.msk.f32.vlgmr.msra.gmra.mrb[6].mxu1 %vm709_vm1, %v874_v40  ;;  %v1396_v40 = vld [vmem:[%s2978_s5 + $0x20] sm:$0xff] }
 0x485   : > { %1974 = vmatprep.mubr.msk.f32.mxu1 %vm2425_vm0, %v2424_v57  ;;  %v2149_v42 = vpack.c.bf16 %v1397_v41, %v1396_v40 }
 0x487   : > { %2150 = vmatpush3.bf16.msra.mxu0 %v2149_v42 }
 0x488   : > { %2151 = vmatprep.subr.bf16.mxu0 %v2423_v5 }
 0x48b   : > { %2153 = vmatpush3.bf16.msra.mxu0 %v2152_v45 }
 0x48c   : > { %2154 = vmatprep.subr.bf16.mxu0 %v2423_v5 }
 0x48f   : > { %2156 = vmatpush3.bf16.msra.mxu0 %v2155_v48 }
 0x490   : > { %2157 = vmatprep.subr.bf16.mxu0 %v2423_v5 }
 0x54a   : > { %v1115_v51 = vpop.f32.mrb[2].mxu0 }
 0x54b   : > { %v1119_v52 = vmul.f32 0.17677669, %v1115_v51  ;;  %v1981_v53 = vpop.f32.mrb[3].mxu0  ;;  %v2158_v51 = vpack.c.bf16 %v1403_v50, %v1402_v49  ;;  %v1615_v49 = vld [vmem:[%s2984_s11] sm:$0xff]  ;;  %v1616_v50 = vld [vmem:[%s2984_s11 + $0x8] sm:$0xff] }
 0x54c   : > { %v1405_v53 = vld [vmem:[%s2978_s5 + $0x68] sm:$0xff] }
 0x54d   : > { %v1120_v54 = vsel %vm2699_vm2, -1e+09, %v1119_v52  ;;  %2159 = vmatpush3.bf16.msra.mxu0 %v2158_v51  ;;  %v1404_v52 = vld [vmem:[%s2978_s5 + $0x60] sm:$0xff]  ;;  %v2191_v51 = vpack.c.bf16 %v1616_v50, %v1615_v49 }
 0x54e   : > { %v1282_v55 = vpop.f32.mrb[4].mxu0  ;;  %v1121_v56 = vsel %vm788_vm3, %v1120_v54, -inf  ;;  %2160 = vmatprep.subr.bf16.mxu0 %v2423_v5 }
 0x54f   : > { %1122 = vmax.xlane.f32.xlu1 %v1121_v56  ;;  %v1991_v58 = vpop.f32.mrb[5].mxu0  ;;  %v1286_v62 = vmul.f32 0.17677669, %v1282_v55  ;;  %v1406_v55 = vld [vmem:[%s2978_s5 + $0x70] sm:$0xff]  ;;  %v1407_v56 = vld [vmem:[%s2978_s5 + $0x78] sm:$0xff] }
 0x550   : > { %v2164_v58 = vpack.c.bf16 %v1407_v56, %v1406_v55  ;;  %v1619_v55 = vld [vmem:[%s2984_s11 + $0x20] sm:$0xff]  ;;  %v1620_v56 = vld [vmem:[%s2984_s11 + $0x28] sm:$0xff] }
 0x551   : > { %v1287_v3 = vsel %vm2699_vm2, -1e+09, %v1286_v62 }
 0x552   : > { %v1288_v4 = vsel %vm788_vm3, %v1287_v3, -inf }
 0x553   : > { %v2732_v59 = vpop.f32.mrb[4].mxu1 }
 0x554   : > { %v1966_v60 = vpop.f32.mrb[5].mxu1 }
 0x557   : > { %v947_v61 = vpop.f32.mrb[6].mxu1 }
 0x558   : > { %v951_v63 = vmul.f32 0.17677669, %v947_v61  ;;  %v1971_v0 = vpop.f32.mrb[7].mxu1 }
 0x55a   : > { %v952_v1 = vsel %vm2699_vm2, -1e+09, %v951_v63 }
 0x55b   : > { %v953_v2 = vsel %vm788_vm3, %v952_v1, -inf }
 0x55c   : > { %954 = vmax.xlane.f32.xlu0 %v953_v2 }
 0x560   : > { %1289 = vmax.xlane.f32.xlu0 %v1288_v4 }
 0x5dc   : > { %v1123_v6 = vpop.xlane.xlu1 %1122 }
 0x5dd   : > { %v1124_v7 = vsub.f32 %v1120_v54, %v1123_v6  ;;  %v2161_v54 = vpack.c.bf16 %v1405_v53, %v1404_v52  ;;  %v1617_v52 = vld [vmem:[%s2984_s11 + $0x10] sm:$0xff]  ;;  %v1618_v53 = vld [vmem:[%s2984_s11 + $0x18] sm:$0xff] }
 0x5df   : > { %v1125_v8 = vmul.f32 1.442695, %v1124_v7  ;;  %2162 = vmatpush3.bf16.msra.mxu0 %v2161_v54  ;;  %v2194_v54 = vpack.c.bf16 %v1618_v53, %v1617_v52 }
 0x5e0   : > { %2163 = vmatprep.subr.bf16.mxu0 %v2423_v5 }
 0x5e1   : > { %2273 = vpow2.f32 %v1125_v8 }
 0x5e3   : > { %2165 = vmatpush3.bf16.msra.mxu0 %v2164_v58  ;;  %v2197_v58 = vpack.c.bf16 %v1620_v56, %v1619_v55 }
 0x5e4   : > { %2190 = vmatprep.subr.bf16.mxu0 %v2423_v5 }
 0x5e9   : > { %v955_v9 = vpop.xlane.xlu0 %954 }
 0x5ea   : > { %v956_v10 = vsub.f32 %v952_v1, %v955_v9  ;;  %v1836_v9 = vld [vmem:[%s2979_s6] ss:$0 sm:$0xff] }
 0x5eb   : > { %v2274_v11 = vpop.eup %2273 }
 0x5ec   : > { %v957_v12 = vmul.f32 1.442695, %v956_v10  ;;  %v1127_v13 = vsel %vm788_vm3, %v2274_v11, 0.0 }
 0x5ed   : > { %1128 = vadd.xlane.f32.xlu0 %v1127_v13  ;;  %v1290_v14 = vpop.xlane.xlu0 %1289 }
 0x5ee   : > { %2275 = vpow2.f32 %v957_v12  ;;  %v1291_v15 = vsub.f32 %v1287_v3, %v1290_v14  ;;  %v1514_v14 = vld [vmem:[%s2982_s9 + $0x8] sm:$0xff] }
 0x5f0   : > { %v1292_v16 = vmul.f32 1.442695, %v1291_v15 }
 0x5f2   : > { %2277 = vpow2.f32 %v1292_v16  ;;  %v1516_v16 = vld [vmem:[%s2982_s9 + $0x18] sm:$0xff] }
 0x5f8   : > { %v2276_v17 = vpop.eup %2275 }
 0x5f9   : > { %v959_v18 = vsel %vm788_vm3, %v2276_v17, 0.0 }
 0x5fa   : > { %960 = vadd.xlane.f32.xlu0 %v959_v18  ;;  %v1518_v18 = vld [vmem:[%s2982_s9 + $0x28] sm:$0xff] }
 0x5fc   : > { %v2278_v19 = vpop.eup %2277 }
 0x5fd   : > { %v1294_v20 = vsel %vm788_vm3, %v2278_v19, 0.0 }
 0x5fe   : > { %1295 = vadd.xlane.f32.xlu1 %v1294_v20 }
 0x60f   : > { %1132 = vrot.lane.b32.xlu1 %v2687_v26, %s2428_s17 }
 0x610   : > { %965 = vrot.lane.b32.xlu0 %v2687_v26, %s2426_s12 }
 0x613   : > { %1299 = vrot.lane.b32.xlu1 %v2687_v26, %s2427_s23 }
 0x67a   : > { %v1129_v21 = vpop.xlane.xlu0 %1128 }
 0x687   : > { %v961_v22 = vpop.xlane.xlu0 %960 }
 0x688   : > { %2279 = vrcp.f32 %v961_v22 }
 0x689   : > { %2281 = vrcp.f32 %v1129_v21 }
 0x68b   : > { %v1296_v23 = vpop.xlane.xlu1 %1295  ;;  %v966_v25 = vpop.permute.xlu0 %965 }
 0x68c   : > { %1973 = vmatpush3.msra.mxu1 %v966_v25  ;;  %2283 = vrcp.f32 %v1296_v23  ;;  %v1519_v25 = vld [vmem:[%s2982_s9 + $0x30] sm:$0xff] }
 0x68d   : > { %1982 = vmatprep.subr.mxu1 %v2424_v57 }
 0x68f   : > { %v1133_v29 = vpop.permute.xlu1 %1132 }
 0x692   : > { %v2280_v27 = vpop.eup %2279 }
 0x693   : > { %v963_v28 = vmul.f32 %v2280_v27, %v2276_v17  ;;  %v2282_v30 = vpop.eup %2281  ;;  %v1300_v32 = vpop.permute.xlu1 %1299  ;;  %v1517_v17 = vld [vmem:[%s2982_s9 + $0x20] sm:$0xff]  ;;  %v1520_v27 = vld [vmem:[%s2982_s9 + $0x38] sm:$0xff] }
 0x694   : > { %v1131_v26 = vmul.f32 %v2282_v30, %v2274_v11  ;;  %v1522_v30 = vld [vmem:[%s2982_s9 + $0x48] sm:$0xff] }
 0x695   : > { %1975 = vmatmul.mubr.msk.f32.vlgmr.msra.gmra.mrb[8].mxu1 %vm788_vm3, %v963_v28  ;;  %v2176_v28 = vpack.c.bf16 %v1520_v27, %v1519_v25 }
 0x696   : > { %1983 = vmatpush3.msra.mxu1 %v1133_v29  ;;  %1984 = vmatprep.mubr.msk.f32.mxu1 %vm2425_vm0, %v2424_v57  ;;  %v2284_v31 = vpop.eup %2283  ;;  %v1521_v29 = vld [vmem:[%s2982_s9 + $0x40] sm:$0xff] }
 0x697   : > { %1992 = vmatprep.subr.mxu1 %v2424_v57  ;;  %v1298_v33 = vmul.f32 %v2284_v31, %v2278_v19  ;;  %v2173_v19 = vpack.c.bf16 %v1518_v18, %v1517_v17  ;;  %v2179_v31 = vpack.c.bf16 %v1522_v30, %v1521_v29 }
 0x699   : > { %1985 = vmatmul.mubr.msk.f32.vlgmr.msra.gmra.mrb[10].mxu1 %vm788_vm3, %v1131_v26  ;;  %v1523_v26 = vld [vmem:[%s2982_s9 + $0x50] sm:$0xff] }
 0x69a   : > { %1993 = vmatpush3.msra.mxu1 %v1300_v32  ;;  %1994 = vmatprep.mubr.msk.f32.mxu1 %vm2425_vm0, %v2424_v57  ;;  %v1524_v32 = vld [vmem:[%s2982_s9 + $0x58] sm:$0xff] }
 0x69b   : > { %2166 = vmatprep.subr.bf16.mxu1 %v2423_v5 }
 0x69d   : > { %1995 = vmatmul.mubr.msk.f32.vlgmr.msra.gmra.mrb[12].mxu1 %vm788_vm3, %v1298_v33  ;;  %v2182_v33 = vpack.c.bf16 %v1524_v32, %v1523_v26 }
 0x69e   : > { %2064 = vmatprep.mubr.msk.f32.mxu1 %vm2425_vm0, %v2424_v57 }
 0x768   : > { %v1037_v60 = vpop.f32.mrb[8].mxu1 }
 0x769   : > { %1376 = vrot.lane.b32.xlu1 %v1037_v60, %s2427_s23  ;;  %v1976_v61 = vpop.f32.mrb[9].mxu1  ;;  %v1621_v60 = vld [vmem:[%s2984_s11 + $0x30] sm:$0xff] }
 0x76a   : > { %v1622_v61 = vld [vmem:[%s2984_s11 + $0x38] sm:$0xff] }
 0x76c   : > { %v1204_v62 = vpop.f32.mrb[10].mxu1 }
 0x76d   : > { %1380 = vrot.lane.b32.xlu0 %v1204_v62, %s2428_s17  ;;  %v1986_v63 = vpop.f32.mrb[11].mxu1  ;;  %v2200_v62 = vpack.c.bf16 %v1622_v61, %v1621_v60  ;;  %s3016_s17 = sld [smem:[#allocation16_spill]] }
 0x76e   : > { %v1839_v63 = vld [vmem:[%s3014_s21] ss:$0 sm:$0xff]  ;;  %s2347_s21 = scalar_lea.vmem %s2931_s19, 128 }
 0x76f   : > { %p2348_p6 = scmp.ne.s32.totalorder %s2931_s19, %s2347_s21  ;;  %p2355_p3 = scmp.lt.s32.totalorder %s2353_s15, %s2347_s21 }
 0x770   : > { %v1371_v0 = vpop.f32.mrb[12].mxu1 }
 0x771   : > { %1384 = vrot.lane.b32.xlu1 %v1371_v0, %s2426_s12  ;;  %v1996_v1 = vpop.f32.mrb[13].mxu1  ;;  %p2349_p8 = pnand %p2348_p6, %p2591_p12  ;;  %p2356_p7 = por %p2355_p3, %p2354_p13 }
 0x773   : > { %s2929_s12 = scalar_lea.hbm %s3016_s17, %s1843_s18  ;;  %p2350_p10 = pneg %p2349_p8 }
 0x775   : > { %p2357_p9 = pnand %p2356_p7, %p2350_p10 }
 0x7db   : > { %v1377_v2 = vpop.permute.xlu1 %1376 }
 0x7dc   : > { %v1387_v4 = vsel %vm709_vm1, %v2732_v59, %v1377_v2  ;;  %v1513_v59 = vld [vmem:[%s2982_s9] sm:$0xff] }
 0x7dd   : > { %v2167_v15 = vpack.c.bf16 %v1514_v14, %v1513_v59 }
 0x7df   : > { %v1381_v3 = vpop.permute.xlu0 %1380  ;;  %2168 = vmatpush3.bf16.msra.mxu1 %v2167_v15 }
 0x7e0   : > { %v1389_v6 = vsel %vm1388_vm4, %v1387_v4, %v1381_v3  ;;  %2169 = vmatprep.subr.bf16.mxu1 %v2423_v5 }
 0x7e3   : > { %v1385_v7 = vpop.permute.xlu1 %1384 }
 0x7e4   : > { %v1391_v8 = vsel %vm1390_vm5, %v1389_v6, %v1385_v7 }
 0x7e5   : > { %2030 = vmatmul.mubr.f32.vlgmr.msra.gmra.mrb[6].mxu0 %v1391_v8 }
 0x7e6   : > { %2083 = vmatprep.mubr.msk.f32.mxu0 %vm2425_vm0, %v2424_v57  ;;  %v1515_v57 = vld [vmem:[%s2982_s9 + $0x10] sm:$0xff]  ;;  %2192 = vmatpush3.bf16.msra.mxu0 %v2191_v51 }
 0x7e7   : > { %2193 = vmatprep.subr.bf16.mxu0 %v2423_v5 }
 0x7ea   : > { %2195 = vmatpush3.bf16.msra.mxu0 %v2194_v54 }
 0x7eb   : > { %2196 = vmatprep.subr.bf16.mxu0 %v2423_v5 }
 0x7ee   : > { %2198 = vmatpush3.bf16.msra.mxu0 %v2197_v58 }
 0x7ef   : > { %2199 = vmatprep.subr.bf16.mxu0 %v2423_v5 }
 0x7f2   : > { %2201 = vmatpush3.bf16.msra.mxu0 %v2200_v62 }
 0x8b8   : > { %v1481_v10 = vpop.f32.mrb[6].mxu0 }
 0x8b9   : > { %v1482_v11 = vadd.f32 %v1836_v9, %v1481_v10  ;;  %v2031_v12 = vpop.f32.mrb[7].mxu0 }
 0x8ba   : > { %v1840_v12 = vld [vmem:[%s3015_s30] ss:$0 sm:$0xff] }
 0x8bb   : > { %v1485_v13 = vadd.f32 %v1482_v11, %v2679_v24  ;;  %v2170_v24 = vpack.c.bf16 %v1516_v16, %v1515_v57 }
 0x8bd   : > { %1488 = vadd.xlane.f32.xlu0 %v1485_v13  ;;  %2171 = vmatpush3.bf16.msra.mxu1 %v2170_v24 }
 0x8be   : > { %2172 = vmatprep.subr.bf16.mxu1 %v2423_v5 }
 0x8c1   : > { %2174 = vmatpush3.bf16.msra.mxu1 %v2173_v19 }
 0x8c2   : > { %2175 = vmatprep.subr.bf16.mxu1 %v2423_v5 }
 0x8c5   : > { %2177 = vmatpush3.bf16.msra.mxu1 %v2176_v28 }
 0x8c6   : > { %2178 = vmatprep.subr.bf16.mxu1 %v2423_v5 }
 0x8c9   : > { %2180 = vmatpush3.bf16.msra.mxu1 %v2179_v31 }
 0x8ca   : > { %2181 = vmatprep.subr.bf16.mxu1 %v2423_v5 }
 0x8cd   : > { %2183 = vmatpush3.bf16.msra.mxu1 %v2182_v33 }
 0x8ce   : > { %2184 = vmatprep.subr.bf16.mxu1 %v2423_v5 }
 0x8d1   : > { %2186 = vmatpush3.bf16.msra.mxu1 %v2185_v36 }
 0x8d2   : > { %2187 = vmatprep.subr.bf16.mxu1 %v2423_v5 }
 0x8d5   : > { %2189 = vmatpush3.bf16.msra.mxu1 %v2188_v39 }
 0x94a   : > { %v1489_v20 = vpop.xlane.xlu0 %1488 }
 0x94b   : > { %v1490_v21 = vmul.f32 0.0078125, %v1489_v20 }
 0x94d   : > { %v1491_v22 = vsub.f32 %v1485_v13, %v1490_v21 }
 0x94f   : > { %v1492_v23 = vmul.f32 %v1491_v22, %v1491_v22 }
 0x951   : > { %1493 = vadd.xlane.f32.xlu1 %v1492_v23 }
 0x9de   : > { %v1494_v40 = vpop.xlane.xlu1 %1493 }
 0x9df   : > { %v1495_v41 = vmul.f32 0.0078125, %v1494_v40 }
 0x9e1   : > { %v1496_v42 = vadd.f32 1e-05, %v1495_v41 }
 0x9e3   : > { %2285 = vrsqrt.f32 %v1496_v42 }
 0x9ed   : > { %v2286_v43 = vpop.eup %2285 }
 0x9ee   : > { %v1498_v45 = vmul.f32 %v2286_v43, %v1491_v22 }
 0x9f0   : > { %v1505_v47 = vmul.f32 %v1837_v44, %v1498_v45 }
 0x9f2   : > { %v1512_v48 = vadd.f32 %v1838_v46, %v1505_v47 }
 0x9f4   : > { %2065 = vmatmul.mubr.f32.vlgmr.msra.gmra.mrb[14].mxu1 %v1512_v48 }
 0xac7   : > { %v1602_v0 = vpop.f32.mrb[14].mxu1 }
 0xac8   : > { %v1603_v1 = vadd.f32 %v1839_v63, %v1602_v0  ;;  %v2066_v2 = vpop.f32.mrb[15].mxu1 }
 0xaca   : > { %v1607_v3 = vmul.f32 0.044715, %v1603_v1  ;;  %v1606_v10 = vmul.f32 0.5, %v1603_v1 }
 0xacc   : > { %v1608_v4 = vmul.f32 %v1607_v3, %v1603_v1 }
 0xace   : > { %v1609_v6 = vmul.f32 %v1608_v4, %v1603_v1 }
 0xad0   : > { %v1610_v7 = vadd.f32 %v1609_v6, %v1603_v1 }
 0xad2   : > { %v1611_v8 = vmul.f32 0.7978846, %v1610_v7 }
 0xad4   : > { %2287 = vtanh.f32 %v1611_v8 }
 0xade   : > { %v2288_v9 = vpop.eup %2287 }
 0xadf   : > { %v1613_v5 = vadd.f32 1.0, %v2288_v9 }
 0xae1   : > { %v1614_v11 = vmul.f32 %v1613_v5, %v1606_v10 }
 0xae3   : > { %2084 = vmatmul.mubr.msk.f32.vlgmr.msra.gmra.mrb[8].mxu0 %vm1388_vm4, %v1614_v11 }
 0xbb6   : > { %v1699_v13 = vpop.f32.mrb[8].mxu0 }
 0xbb7   : > { %v1700_v59 = vadd.f32 %v1840_v12, %v1699_v13  ;;  %v2085_v14 = vpop.f32.mrb[9].mxu0 }
 0xbb9   : > { %v1703_v57 = vadd.f32 %v1700_v59, %v1512_v48 }
 0xbbb   : > { %1704 = vst [vmem:[%s483_s10] sm:$0xff] %v1703_v57 }
 0xbbc   : > { %2360 = shalt.err (!%p2357_p9)
}
 0xbbd   : > { %s2361_s13 = scalar_lea.hbm %s2929_s12, 128  ;;  %s2365_s18 = scalar_lea.hbm %s3016_s17, 256 }
 0xbbe   : > { %p2362_p2 = scmp.ne.s32.totalorder %s2929_s12, %s2361_s13  ;;  %p2366_p11 = scmp.lt.u32.totalorder %s2929_s12, %s3016_s17 }
 0xbbf   : > { %p2367_p1 = scmp.lt.u32.totalorder %s2365_s18, %s2361_s13  ;;  %p2369_p6 = scmp.lt.u32.totalorder %s2361_s13, %s2929_s12 }
 0xbc0   : > { %p2363_p5 = pnand %p2362_p2, %p2591_p12 }
 0xbc1   : > { %p2368_p4 = por %p2367_p1, %p2366_p11 }
 0xbc2   : > { %p2364_p0 = pneg %p2363_p5 }
 0xbc3   : > { %p2370_p8 = por %p2369_p6, %p2368_p4 }
 0xbc5   : > { %p2371_p10 = pnand %p2370_p8, %p2364_p0 }
 0xbc7   : > { %2374 = shalt.err (!%p2371_p10)
}
 0xbc8   : > { %2208 = dma.vmem_to_hbm [thread:$0]  (%p2591_p12), %s2931_s19, 128, %s2929_s12, %s1706_s25  }
 0xbc9 PF: > { %s3017_s23 = sld [smem:[#allocation11_spill]]  ;;  %s3018_s21 = sld [smem:[#allocation12_spill]] }
 0xbca   : > { %p3020_p3 = scmp.ge.s32.totalorder %s2417_s28, 2 }
 0xbcf   : > { %s1731_s29 = sand.u32 1, %s3017_s23   ;;  %p3019_p13 = scmp.ne.s32.totalorder %s3018_s21, 0 }
 0xbd0   : > { %s1732_s22 = scalar_lea.sflag [#allocation4], %s1731_s29 }
 0xbd1   : > { %p2219_p7 = pnand %p3020_p3, %p3019_p13 }
 0xbd3   : > { %2400 = dma.done.wait (!%p2219_p7), %s1732_s22, 128  }
 0xbd4   : > { %2402 = vsyncadd (!%p2219_p7), %s1732_s22, 4294967168  ;;  %s3021_s28 = sld [smem:[#allocation13_spill]]  ;;  %s3022_s25 = smov %s2409_s26 }
 0xbd5   : > { %s3023_s26 = smov %s2413_s27  ;;  %s3024_s27 = smov %s2587_s20 }
 0xbda   : > { %p27_p9 = scmp.ge.s32.totalorder %s3021_s28, 4  }
 0xbdc   :  { %29 = sbr.rel (!%p27_p9) target bundleno = 10 (0xa), region = 124 }
 0xbe3   :  { %1737 = vsyncpa [#allocation3], 1 }
 0xbe4   :  { %1739 = vsyncpa [#allocation3 + $0x1], 1 }
 0xbe5   :  { %1740 = vsyncpa [#allocation6], 1 }
 0xbe6   :  { %1741 = vsyncpa [#allocation4], 1 }
 0xbe7   :  { %1743 = vsyncpa [#allocation4 + $0x1], 1 }

</bundles_post_ra>
